<compile_context>
chip_gen: v5e
topology: v5e:2x2
jax: 0.10.0
libtpu: 0.0.40
codegen_flags: <defaults>
</compile_context>

<pallas_src>
import functools

import jax
import jax.numpy as jnp
from jax import lax
from jax.experimental import pallas as pl
from jax.experimental.pallas import tpu as pltpu


def _pair(v):
    return (v, v) if isinstance(v, int) else tuple(v)


def _ds(start, size, stride):
    return pl.ds(start, size) if stride == 1 else pl.ds(start, size, stride=stride)


def _rup(a, m):
    return -(-a // m) * m


def _avgpool_kernel(pw_ref, x_ref, o_ref, rows_ref, *, kh, sh, ph, inv_div):
    # x_ref:    (f_blk, H, W)   natural layout (W on lanes, H on sublanes)
    # pw_ref:   (W, Wo)         0/1 banded W-pooling matrix, W padding folded in
    # rows_ref: (f_blk, Hp, Wo) f32 per-row W-window sums, Hp = H + 2*ph
    # o_ref:    (f_blk, Ho, Wo)
    f_blk, H, W = x_ref.shape
    Wo = pw_ref.shape[1]
    Ho = o_ref.shape[1]
    Hp = rows_ref.shape[1]

    # --- W pooling on the idle MXU: one matmul, f32 accumulation.
    xm = x_ref[...].reshape(f_blk * H, W)
    t = jnp.dot(xm, pw_ref[...], preferred_element_type=jnp.float32)

    # --- H padding: only the 2*ph border rows need zeros.  Rewritten every
    # step (tiny: 2*ph rows) so there is no cross-step scratch state and the
    # grid can be sharded across TensorCores safely.
    if ph > 0:
        rows_ref[:, 0:ph, :] = jnp.zeros((f_blk, ph, Wo), jnp.float32)
        rows_ref[:, ph + H:Hp, :] = jnp.zeros((f_blk, ph, Wo), jnp.float32)
    rows_ref[:, ph:ph + H, :] = t.reshape(f_blk, H, Wo)

    # --- H pooling: kh strided sublane slices (addressing + VPU adds).
    acc = rows_ref[:, _ds(0, Ho, sh), :]
    for di in range(1, kh):
        acc = acc + rows_ref[:, _ds(di, Ho, sh), :]

    o_ref[...] = (acc * inv_div).astype(o_ref.dtype)


def avg_pool2d_fused(x, kernel_size, stride=None, padding=0, ceil_mode=False,
                     count_include_pad=True, divisor_override=None):
    """x: (N, B, C, H, W). Returns (N, B, C, H_out, W_out)."""
    assert not ceil_mode, "ceil_mode=False only"  # TODO(synk): ceil_mode support
    kh, kw = _pair(kernel_size)
    sh, sw = _pair(stride if stride is not None else kernel_size)
    ph, pw = _pair(padding)

    N, B, C, H, W = x.shape
    F = N * B * C
    Hp = H + 2 * ph
    Ho = (Hp - kh) // sh + 1
    Wo = (W + 2 * pw - kw) // sw + 1
    assert Ho >= 1 and Wo >= 1

    if divisor_override is not None:
        divisor = float(divisor_override)
    else:
        assert count_include_pad, (
            "count_include_pad=False not implemented")  # TODO(synk): per-window divisors
        divisor = float(kh * kw)

    # 0/1 banded W-pooling matrix with W padding folded in:
    # pw_mat[w, wo] = 1 iff wo*sw - pw <= w < wo*sw - pw + kw.
    w_idx = jnp.arange(W, dtype=jnp.int32)[:, None]
    w_lo = jnp.arange(Wo, dtype=jnp.int32)[None, :] * sw - pw
    pw_mat = ((w_idx >= w_lo) & (w_idx < w_lo + kw)).astype(x.dtype)

    # --- generation-aware VMEM budgeting (v5e/v6e: 128 MiB, v7x: 64 MiB).
    try:
        vmem_cap = int(pltpu.get_tpu_info().vmem_capacity_bytes)
    except Exception:  # conservative fallback if query unavailable
        vmem_cap = 64 * 1024 * 1024
    vmem_limit = min((vmem_cap * 3) // 4, 96 * 1024 * 1024)
    budget = min(vmem_limit // 2, 40 * 1024 * 1024)

    itemsize = jnp.dtype(x.dtype).itemsize
    sub = max(8, 32 // itemsize)            # sublane multiple: 8 f32 / 16 bf16 / 32 i8
    per_f = (_rup(H, sub) * _rup(W, 128) * itemsize * 2       # input tile, dbl-buffered
             + _rup(Ho, sub) * _rup(Wo, 128) * itemsize * 2   # output tile, dbl-buffered
             + _rup(Hp, 8) * _rup(Wo, 128) * 4                # f32 row-sum scratch
             + 2 * _rup(H, 8) * _rup(Wo, 128) * 4)            # f32 matmul/acc temporaries
    f_max = max(1, budget // per_f)
    if F <= f_max:
        # Whole fused axis fits one tile; still split >= 2 ways when F is big
        # so both TensorCores of dual-core parts share the grid.
        f_blk = _rup(pl.cdiv(F, 2), 8) if F >= 512 else F
    else:
        f_blk = (f_max // 8) * 8 if f_max >= 8 else f_max
    f_blk = min(f_blk, F)
    grid_f = pl.cdiv(F, f_blk)
    # TODO(synk): very large H*W with tiny F can still exceed VMEM per tile;
    # that regime needs an additional H-blocked (haloed) grid axis.

    xf = x.reshape(F, H, W)                 # free row-major collapse, no transpose

    kernel = functools.partial(_avgpool_kernel, kh=kh, sh=sh, ph=ph,
                               inv_div=1.0 / divisor)

    yf = pl.pallas_call(
        kernel,
        out_shape=jax.ShapeDtypeStruct((F, Ho, Wo), x.dtype),
        grid_spec=pltpu.PrefetchScalarGridSpec(
            num_scalar_prefetch=0,
            grid=(grid_f,),
            in_specs=[pl.BlockSpec((W, Wo), lambda f: (0, 0)),
                      pl.BlockSpec((f_blk, H, W), lambda f: (f, 0, 0))],
            out_specs=pl.BlockSpec((f_blk, Ho, Wo), lambda f: (f, 0, 0)),
            scratch_shapes=[pltpu.VMEM((f_blk, Hp, Wo), jnp.float32)]),
        compiler_params=pltpu.CompilerParams(
            dimension_semantics=("parallel",),
            vmem_limit_bytes=int(vmem_limit)),
    )(pw_mat, xf)

    # TODO(synk): when Wo < 128 the (f_blk, Ho, Wo) store is lane-masked; an
    # in-kernel (Ho, Wo) -> Ho*Wo lane fold would make it fully dense.
    return yf.reshape(N, B, C, Ho, Wo)


def _reference(x, kernel_size, stride, padding):
    # Pure-JAX reference (count_include_pad=True semantics).
    kh, kw = _pair(kernel_size)
    sh, sw = _pair(stride if stride is not None else kernel_size)
    ph, pw = _pair(padding)
    N, B, C, H, W = x.shape
    xf = x.reshape(N * B, C, H, W).astype(jnp.float32)
    xp = jnp.pad(xf, ((0, 0), (0, 0), (ph, ph), (pw, pw)))
    s = lax.reduce_window(xp, 0.0, lax.add,
                          window_dimensions=(1, 1, kh, kw),
                          window_strides=(1, 1, sh, sw),
                          padding="VALID")
    out = (s / (kh * kw)).astype(x.dtype)
    Ho, Wo = out.shape[-2:]
    return out.reshape(N, B, C, Ho, Wo)


if __name__ == "__main__":
    # Module config: AvgPool2d(kernel_size=3, stride=2, padding=1, B=3)
    N, B, C, H, W = 2, 3, 4, 16, 16
    key = jax.random.PRNGKey(0)
    x = jax.random.normal(key, (N, B, C, H, W), dtype=jnp.float32)
    # Round inputs to bf16-representable values so the self-check is exact
    # regardless of the MXU's f32 pass count; indexing/padding/divisor bugs
    # would still show up as O(1) errors.
    x = x.astype(jnp.bfloat16).astype(jnp.float32)

    for (ks, st, pd) in [(3, 2, 1), (2, 2, 0)]:
        pool = jax.jit(functools.partial(avg_pool2d_fused, kernel_size=ks,
                                         stride=st, padding=pd))
        y = jax.block_until_ready(pool(x))
        y_ref = _reference(x, ks, st, pd)
        assert y.shape == y_ref.shape, (y.shape, y_ref.shape)
        assert jnp.allclose(y, y_ref, atol=1e-5, rtol=1e-5), (
            ks, st, pd, float(jnp.max(jnp.abs(y - y_ref))))

    print("KERNEL_OK")
</pallas_src>

<mosaic_0001>
module attributes {stable_mosaic.version = 11 : i64} {
  func.func @_avgpool_kernel(%arg0: i32, %arg1: memref<16x8xf32, #tpu.memory_space<vmem>>, %arg2: memref<24x16x16xf32, #tpu.memory_space<vmem>>, %arg3: memref<24x8x8xf32, #tpu.memory_space<vmem>>, %arg4: memref<24x18x8xf32, #tpu.memory_space<vmem>>) attributes {dimension_semantics = [#tpu.dimension_semantics<parallel>], iteration_bounds = array<i64: 1>, scalar_prefetch = 0 : i64, scratch_operands = 1 : i64, tpu.core_type = #tpu.core_type<tc>, window_params = [{pipeline_mode = #tpu.pipeline_mode<synchronous>, transform_indices = @transform_0, window_bounds = array<i64: 16, 8>}, {transform_indices = @transform_1, window_bounds = array<i64: 24, 16, 16>}, {transform_indices = @transform_2, window_bounds = array<i64: 24, 8, 8>}]} {
    %c0 = arith.constant 0 : index
    %c0_0 = arith.constant 0 : index
    %c0_1 = arith.constant 0 : index
    %0 = vector.load %arg2[%c0, %c0_0, %c0_1] : memref<24x16x16xf32, #tpu.memory_space<vmem>>, vector<24x16x16xf32>
    %1 = vector.shape_cast %0 : vector<24x16x16xf32> to vector<384x16xf32>
    %c0_2 = arith.constant 0 : index
    %c0_3 = arith.constant 0 : index
    %2 = vector.load %arg1[%c0_2, %c0_3] : memref<16x8xf32, #tpu.memory_space<vmem>>, vector<16x8xf32>
    %cst = arith.constant dense<0.000000e+00> : vector<384x8xf32>
    %3 = tpu.matmul %1, %2, %cst {dimension_numbers = #tpu.dot_dimension_numbers<[1], [0], [0], [1], [0, 0, 1, 1], [], []>} : vector<384x16xf32>, vector<16x8xf32>, vector<384x8xf32> -> vector<384x8xf32>
    %cst_4 = arith.constant 0.000000e+00 : f32
    %4 = vector.broadcast %cst_4 : f32 to vector<24x1x8xf32>
    %c0_5 = arith.constant 0 : index
    %c0_6 = arith.constant 0 : index
    %c0_7 = arith.constant 0 : index
    %5 = vector.load %arg4[%c0_5, %c0_6, %c0_7] : memref<24x18x8xf32, #tpu.memory_space<vmem>>, vector<24x1x8xf32>
    tpu.vector_store %arg4[%c0_5, %c0_6, %c0_7], %4 {strides = array<i32>} : memref<24x18x8xf32, #tpu.memory_space<vmem>>, vector<24x1x8xf32>,
    %cst_8 = arith.constant 0.000000e+00 : f32
    %6 = vector.broadcast %cst_8 : f32 to vector<24x1x8xf32>
    %c0_9 = arith.constant 0 : index
    %c17 = arith.constant 17 : index
    %c0_10 = arith.constant 0 : index
    %7 = vector.load %arg4[%c0_9, %c17, %c0_10] : memref<24x18x8xf32, #tpu.memory_space<vmem>>, vector<24x1x8xf32>
    tpu.vector_store %arg4[%c0_9, %c17, %c0_10], %6 {strides = array<i32>} : memref<24x18x8xf32, #tpu.memory_space<vmem>>, vector<24x1x8xf32>,
    %8 = vector.shape_cast %3 : vector<384x8xf32> to vector<24x16x8xf32>
    %c0_11 = arith.constant 0 : index
    %c1 = arith.constant 1 : index
    %c0_12 = arith.constant 0 : index
    %9 = vector.load %arg4[%c0_11, %c1, %c0_12] : memref<24x18x8xf32, #tpu.memory_space<vmem>>, vector<24x16x8xf32>
    tpu.vector_store %arg4[%c0_11, %c1, %c0_12], %8 {strides = array<i32>} : memref<24x18x8xf32, #tpu.memory_space<vmem>>, vector<24x16x8xf32>,
    %c0_13 = arith.constant 0 : index
    %c0_14 = arith.constant 0 : index
    %c0_15 = arith.constant 0 : index
    %10 = tpu.strided_load %arg4[%c0_13, %c0_14, %c0_15] {strides = array<i32: 1, 2, 1>} : memref<24x18x8xf32, #tpu.memory_space<vmem>>, vector<24x8x8xf32>
    %c0_16 = arith.constant 0 : index
    %c1_17 = arith.constant 1 : index
    %c0_18 = arith.constant 0 : index
    %11 = tpu.strided_load %arg4[%c0_16, %c1_17, %c0_18] {strides = array<i32: 1, 2, 1>} : memref<24x18x8xf32, #tpu.memory_space<vmem>>, vector<24x8x8xf32>
    %12 = arith.addf %10, %11 : vector<24x8x8xf32>
    %c0_19 = arith.constant 0 : index
    %c2 = arith.constant 2 : index
    %c0_20 = arith.constant 0 : index
    %13 = tpu.strided_load %arg4[%c0_19, %c2, %c0_20] {strides = array<i32: 1, 2, 1>} : memref<24x18x8xf32, #tpu.memory_space<vmem>>, vector<24x8x8xf32>
    %14 = arith.addf %12, %13 : vector<24x8x8xf32>
    %cst_21 = arith.constant 0.111111112 : f32
    %15 = vector.broadcast %cst_21 : f32 to vector<24x8x8xf32>
    %16 = arith.mulf %14, %15 : vector<24x8x8xf32>
    %c0_22 = arith.constant 0 : index
    %c0_23 = arith.constant 0 : index
    %c0_24 = arith.constant 0 : index
    %17 = vector.load %arg3[%c0_22, %c0_23, %c0_24] : memref<24x8x8xf32, #tpu.memory_space<vmem>>, vector<24x8x8xf32>
    tpu.vector_store %arg3[%c0_22, %c0_23, %c0_24], %16 {strides = array<i32>} : memref<24x8x8xf32, #tpu.memory_space<vmem>>, vector<24x8x8xf32>,
    return
  }
  func.func @transform_0(%arg0: i32) -> (i32, i32) {
    %c0_i32 = arith.constant 0 : i32
    %c0_i32_0 = arith.constant 0 : i32
    %c0_i32_1 = arith.constant 0 : i32
    return %c0_i32, %c0_i32_0 : i32, i32
  }
  func.func @transform_1(%arg0: i32) -> (i32, i32, i32) {
    %c0_i32 = arith.constant 0 : i32
    %c0_i32_0 = arith.constant 0 : i32
    %c0_i32_1 = arith.constant 0 : i32
    return %arg0, %c0_i32, %c0_i32_0 : i32, i32, i32
  }
  func.func @transform_2(%arg0: i32) -> (i32, i32, i32) {
    %c0_i32 = arith.constant 0 : i32
    %c0_i32_0 = arith.constant 0 : i32
    %c0_i32_1 = arith.constant 0 : i32
    return %arg0, %c0_i32, %c0_i32_0 : i32, i32, i32
  }
}

</mosaic_0001>

<bundles_post_ra>
// kernel: avg_pool2d_fused.1
= control target key start
LH: loop header
LB: loop body
LE: loop exit
PB: predicated region body
PF: predicated region fallthrough
CT: control target
= control target key end

     0   :  { %7 = vsyncpa [#allocation4], 0  ;;  %s1033_s0 = inlined_call_operand.vmem [shape: f32[16,8], index: 0, kind: input, shape index: {}]   ;;  %s1034_s1 = inlined_call_operand.hbm [shape: f32[24,16,16], index: 1, kind: input, shape index: {}]   ;;  %s1035_s2 = inlined_call_operand.hbm [shape: f32[24,8,8], index: 2, kind: output, shape index: {}]  }
   0x1   :  { %8 = vsyncpa [#allocation5], 0  ;;  %s15_s11 = sshll.u32 %s1034_s1, 4  ;;  %s851_s12 = smov [#allocation3]   ;;  %s16_s11 = int_to_ptr.hbm [resolvable:$true] %s15_s11 }
   0x2   :  { %s17_s13 = sshll.u32 %s851_s12, 4  ;;  %s852_s14 = smov 128   ;;  %s18_s13 = int_to_ptr.vmem [resolvable:$true] %s17_s13 }
   0x3   :  { %s853_s15 = smov 8  }
   0x4   :  { %23 = dma.hbm_to_vmem [thread:$0]  %s16_s11, 6144, %s18_s13, [#allocation4], %s852_s14, %s852_s14, %s853_s15  }
   0x5   :  { %847 = dma.done.wait [#allocation4], 6144  }
   0x6   :  { %848 = vsyncadd [#allocation4], 4294961152  ;;  %vm384_vm0 = vcmask 57344   ;;  %v77_v0 = vld [vmem:[%s1033_s0 + $0x8] sm:$0xff]  ;;  %v76_v1 = vld [vmem:[%s1033_s0] sm:$0xff]  ;;  %vm78_vm1 = vcmask 130048  }
   0x7   :  { %237 = vmatpush.msra.mxu0 %v77_v0  ;;  %788 = vmatpush.msra.mxu1 %v77_v0  ;;  %v28_v2 = vld [vmem:[#allocation3] sm:$0xff]  ;;  %v29_v6 = vld [vmem:[#allocation3 + $0x8] sm:$0xff]  ;;  %v854_v10 = vmov 0.0   ;;  %v30_v11 = vld [vmem:[#allocation3 + $0x10] sm:$0xff]  ;;  %vm433_vm2 = vcmask 64512   ;;  %s855_s0 = smov [#allocation6]  }
   0x8   :  { %789 = vmatpush.msra.mxu2 %v77_v0  ;;  %790 = vmatpush.msra.mxu3 %v77_v0  ;;  %v40_v3 = vld [vmem:[#allocation3 + $0x60] sm:$0xff]  ;;  %v41_v7 = vld [vmem:[#allocation3 + $0x68] sm:$0xff]  ;;  %385 = vst.msk [vmem:[#allocation2] sm:$0x1] %vm384_vm0, %v854_v10  ;;  %v42_v12 = vld [vmem:[#allocation3 + $0x70] sm:$0xff]  ;;  %s725_s1 = sshll.u32 %s855_s0, 4  ;;  %s726_s1 = int_to_ptr.vmem [resolvable:$true] %s725_s1 }
   0x9   :  { %238 = vmatpush.msra.mxu0 %v76_v1  ;;  %791 = vmatpush.msra.mxu1 %v76_v1  ;;  %v52_v4 = vld [vmem:[#allocation3 + $0xc0] sm:$0xff]  ;;  %v53_v8 = vld [vmem:[#allocation3 + $0xc8] sm:$0xff]  ;;  %386 = vst.msk [vmem:[#allocation2 + $0x18] sm:$0x1] %vm384_vm0, %v854_v10  ;;  %v54_v13 = vld [vmem:[#allocation3 + $0xd0] sm:$0xff]  ;;  %s727_s22 = sshll.u32 %s1035_s2, 4  ;;  %s728_s22 = int_to_ptr.hbm [resolvable:$true] %s727_s22 }
   0xa   :  { %v64_v5 = vld [vmem:[#allocation3 + $0x120] sm:$0xff]  ;;  %792 = vmatpush.msra.mxu2 %v76_v1  ;;  %793 = vmatpush.msra.mxu3 %v76_v1  ;;  %v65_v9 = vld [vmem:[#allocation3 + $0x128] sm:$0xff]  ;;  %v66_v14 = vld [vmem:[#allocation3 + $0x130] sm:$0xff]  ;;  %387 = vst.msk [vmem:[#allocation2 + $0x30] sm:$0x1] %vm384_vm0, %v854_v10 }
   0xb   :  { %740 = vmatmul.msk.f32.vlgmr.msra.gmra.mxu0 %vm78_vm1, %v28_v2  ;;  %752 = vmatmul.msk.f32.vlgmr.msra.gmra.mxu1 %vm78_vm1, %v40_v3  ;;  %388 = vst.msk [vmem:[#allocation2 + $0x48] sm:$0x1] %vm384_vm0, %v854_v10  ;;  %v31_v15 = vld [vmem:[#allocation3 + $0x18] sm:$0xff]  ;;  %v32_v19 = vld [vmem:[#allocation3 + $0x20] sm:$0xff]  ;;  %v33_v23 = vld [vmem:[#allocation3 + $0x28] sm:$0xff] }
   0xc   :  { %764 = vmatmul.msk.f32.vlgmr.msra.gmra.mxu2 %vm78_vm1, %v52_v4  ;;  %776 = vmatmul.msk.f32.vlgmr.msra.gmra.mxu3 %vm78_vm1, %v64_v5  ;;  %389 = vst.msk [vmem:[#allocation2 + $0x60] sm:$0x1] %vm384_vm0, %v854_v10  ;;  %v43_v16 = vld [vmem:[#allocation3 + $0x78] sm:$0xff]  ;;  %v44_v20 = vld [vmem:[#allocation3 + $0x80] sm:$0xff]  ;;  %v45_v24 = vld [vmem:[#allocation3 + $0x88] sm:$0xff] }
   0xd   :  { %390 = vst.msk [vmem:[#allocation2 + $0x78] sm:$0x1] %vm384_vm0, %v854_v10  ;;  %v55_v17 = vld [vmem:[#allocation3 + $0xd8] sm:$0xff]  ;;  %v56_v21 = vld [vmem:[#allocation3 + $0xe0] sm:$0xff]  ;;  %v57_v25 = vld [vmem:[#allocation3 + $0xe8] sm:$0xff] }
   0xe   :  { %391 = vst.msk [vmem:[#allocation2 + $0x90] sm:$0x1] %vm384_vm0, %v854_v10  ;;  %v67_v18 = vld [vmem:[#allocation3 + $0x138] sm:$0xff]  ;;  %v68_v22 = vld [vmem:[#allocation3 + $0x140] sm:$0xff]  ;;  %v69_v26 = vld [vmem:[#allocation3 + $0x148] sm:$0xff] }
   0xf   :  { %392 = vst.msk [vmem:[#allocation2 + $0xa8] sm:$0x1] %vm384_vm0, %v854_v10  ;;  %v34_v27 = vld [vmem:[#allocation3 + $0x30] sm:$0xff]  ;;  %v35_v31 = vld [vmem:[#allocation3 + $0x38] sm:$0xff]  ;;  %v36_v35 = vld [vmem:[#allocation3 + $0x40] sm:$0xff] }
  0x10   :  { %393 = vst.msk [vmem:[#allocation2 + $0xc0] sm:$0x1] %vm384_vm0, %v854_v10  ;;  %v46_v28 = vld [vmem:[#allocation3 + $0x90] sm:$0xff]  ;;  %v47_v32 = vld [vmem:[#allocation3 + $0x98] sm:$0xff]  ;;  %v48_v36 = vld [vmem:[#allocation3 + $0xa0] sm:$0xff] }
  0x11   :  { %394 = vst.msk [vmem:[#allocation2 + $0xd8] sm:$0x1] %vm384_vm0, %v854_v10  ;;  %v58_v29 = vld [vmem:[#allocation3 + $0xf0] sm:$0xff]  ;;  %v59_v33 = vld [vmem:[#allocation3 + $0xf8] sm:$0xff]  ;;  %v60_v37 = vld [vmem:[#allocation3 + $0x100] sm:$0xff] }
  0x12   :  { %395 = vst.msk [vmem:[#allocation2 + $0xf0] sm:$0x1] %vm384_vm0, %v854_v10  ;;  %v70_v30 = vld [vmem:[#allocation3 + $0x150] sm:$0xff]  ;;  %v71_v34 = vld [vmem:[#allocation3 + $0x158] sm:$0xff]  ;;  %v72_v38 = vld [vmem:[#allocation3 + $0x160] sm:$0xff] }
  0x13   :  { %741 = vmatmul.msk.f32.gmra.mxu0 %vm78_vm1, %v29_v6  ;;  %753 = vmatmul.msk.f32.gmra.mxu1 %vm78_vm1, %v41_v7  ;;  %396 = vst.msk [vmem:[#allocation2 + $0x108] sm:$0x1] %vm384_vm0, %v854_v10  ;;  %v37_v39 = vld [vmem:[#allocation3 + $0x48] sm:$0xff]  ;;  %v38_v43 = vld [vmem:[#allocation3 + $0x50] sm:$0xff]  ;;  %v39_v47 = vld [vmem:[#allocation3 + $0x58] sm:$0xff] }
  0x14   :  { %765 = vmatmul.msk.f32.gmra.mxu2 %vm78_vm1, %v53_v8  ;;  %777 = vmatmul.msk.f32.gmra.mxu3 %vm78_vm1, %v65_v9  ;;  %397 = vst.msk [vmem:[#allocation2 + $0x120] sm:$0x1] %vm384_vm0, %v854_v10  ;;  %v49_v40 = vld [vmem:[#allocation3 + $0xa8] sm:$0xff]  ;;  %v50_v44 = vld [vmem:[#allocation3 + $0xb0] sm:$0xff]  ;;  %v51_v48 = vld [vmem:[#allocation3 + $0xb8] sm:$0xff] }
  0x15   :  { %398 = vst.msk [vmem:[#allocation2 + $0x138] sm:$0x1] %vm384_vm0, %v854_v10  ;;  %v61_v41 = vld [vmem:[#allocation3 + $0x108] sm:$0xff]  ;;  %v62_v45 = vld [vmem:[#allocation3 + $0x110] sm:$0xff]  ;;  %v63_v49 = vld [vmem:[#allocation3 + $0x118] sm:$0xff] }
  0x16   :  { %399 = vst.msk [vmem:[#allocation2 + $0x150] sm:$0x1] %vm384_vm0, %v854_v10  ;;  %v73_v42 = vld [vmem:[#allocation3 + $0x168] sm:$0xff]  ;;  %v74_v46 = vld [vmem:[#allocation3 + $0x170] sm:$0xff]  ;;  %v75_v50 = vld [vmem:[#allocation3 + $0x178] sm:$0xff] }
  0x17   :  { %400 = vst.msk [vmem:[#allocation2 + $0x168] sm:$0x1] %vm384_vm0, %v854_v10 }
  0x18   :  { %401 = vst.msk [vmem:[#allocation2 + $0x180] sm:$0x1] %vm384_vm0, %v854_v10 }
  0x19   :  { %402 = vst.msk [vmem:[#allocation2 + $0x198] sm:$0x1] %vm384_vm0, %v854_v10 }
  0x1a   :  { %403 = vst.msk [vmem:[#allocation2 + $0x1b0] sm:$0x1] %vm384_vm0, %v854_v10 }
  0x1b   :  { %742 = vmatmul.msk.f32.gmra.mxu0 %vm78_vm1, %v30_v11  ;;  %754 = vmatmul.msk.f32.gmra.mxu1 %vm78_vm1, %v42_v12  ;;  %404 = vst.msk [vmem:[#allocation2 + $0x1c8] sm:$0x1] %vm384_vm0, %v854_v10 }
  0x1c   :  { %766 = vmatmul.msk.f32.gmra.mxu2 %vm78_vm1, %v54_v13  ;;  %778 = vmatmul.msk.f32.gmra.mxu3 %vm78_vm1, %v66_v14  ;;  %405 = vst.msk [vmem:[#allocation2 + $0x1e0] sm:$0x1] %vm384_vm0, %v854_v10 }
  0x1d   :  { %406 = vst.msk [vmem:[#allocation2 + $0x1f8] sm:$0x1] %vm384_vm0, %v854_v10 }
  0x1e   :  { %407 = vst.msk [vmem:[#allocation2 + $0x210] sm:$0x1] %vm384_vm0, %v854_v10 }
  0x1f   :  { %408 = vst.msk [vmem:[#allocation2 + $0x228] sm:$0x1] %vm384_vm0, %v854_v10 }
  0x23   :  { %743 = vmatmul.msk.f32.gmra.mxu0 %vm78_vm1, %v31_v15  ;;  %755 = vmatmul.msk.f32.gmra.mxu1 %vm78_vm1, %v43_v16 }
  0x24   :  { %767 = vmatmul.msk.f32.gmra.mxu2 %vm78_vm1, %v55_v17  ;;  %779 = vmatmul.msk.f32.gmra.mxu3 %vm78_vm1, %v67_v18 }
  0x2b   :  { %744 = vmatmul.msk.f32.gmra.mxu0 %vm78_vm1, %v32_v19  ;;  %756 = vmatmul.msk.f32.gmra.mxu1 %vm78_vm1, %v44_v20 }
  0x2c   :  { %768 = vmatmul.msk.f32.gmra.mxu2 %vm78_vm1, %v56_v21  ;;  %780 = vmatmul.msk.f32.gmra.mxu3 %vm78_vm1, %v68_v22 }
  0x33   :  { %745 = vmatmul.msk.f32.gmra.mxu0 %vm78_vm1, %v33_v23  ;;  %757 = vmatmul.msk.f32.gmra.mxu1 %vm78_vm1, %v45_v24 }
  0x34   :  { %769 = vmatmul.msk.f32.gmra.mxu2 %vm78_vm1, %v57_v25  ;;  %781 = vmatmul.msk.f32.gmra.mxu3 %vm78_vm1, %v69_v26 }
  0x3b   :  { %746 = vmatmul.msk.f32.gmra.mxu0 %vm78_vm1, %v34_v27  ;;  %758 = vmatmul.msk.f32.gmra.mxu1 %vm78_vm1, %v46_v28 }
  0x3c   :  { %770 = vmatmul.msk.f32.gmra.mxu2 %vm78_vm1, %v58_v29  ;;  %782 = vmatmul.msk.f32.gmra.mxu3 %vm78_vm1, %v70_v30 }
  0x43   :  { %747 = vmatmul.msk.f32.gmra.mxu0 %vm78_vm1, %v35_v31  ;;  %759 = vmatmul.msk.f32.gmra.mxu1 %vm78_vm1, %v47_v32 }
  0x44   :  { %771 = vmatmul.msk.f32.gmra.mxu2 %vm78_vm1, %v59_v33  ;;  %783 = vmatmul.msk.f32.gmra.mxu3 %vm78_vm1, %v71_v34 }
  0x4b   :  { %748 = vmatmul.msk.f32.gmra.mxu0 %vm78_vm1, %v36_v35  ;;  %760 = vmatmul.msk.f32.gmra.mxu1 %vm78_vm1, %v48_v36 }
  0x4c   :  { %772 = vmatmul.msk.f32.gmra.mxu2 %vm78_vm1, %v60_v37  ;;  %784 = vmatmul.msk.f32.gmra.mxu3 %vm78_vm1, %v72_v38 }
  0x53   :  { %749 = vmatmul.msk.f32.gmra.mxu0 %vm78_vm1, %v37_v39  ;;  %761 = vmatmul.msk.f32.gmra.mxu1 %vm78_vm1, %v49_v40 }
  0x54   :  { %773 = vmatmul.msk.f32.gmra.mxu2 %vm78_vm1, %v61_v41  ;;  %785 = vmatmul.msk.f32.gmra.mxu3 %vm78_vm1, %v73_v42 }
  0x5b   :  { %750 = vmatmul.msk.f32.gmra.mxu0 %vm78_vm1, %v38_v43  ;;  %762 = vmatmul.msk.f32.gmra.mxu1 %vm78_vm1, %v50_v44 }
  0x5c   :  { %774 = vmatmul.msk.f32.gmra.mxu2 %vm78_vm1, %v62_v45  ;;  %786 = vmatmul.msk.f32.gmra.mxu3 %vm78_vm1, %v74_v46 }
  0x63   :  { %751 = vmatmul.msk.f32.gmra.mxu0 %vm78_vm1, %v39_v47  ;;  %763 = vmatmul.msk.f32.gmra.mxu1 %vm78_vm1, %v51_v48 }
  0x64   :  { %775 = vmatmul.msk.f32.gmra.mxu2 %vm78_vm1, %v63_v49  ;;  %787 = vmatmul.msk.f32.gmra.mxu3 %vm78_vm1, %v75_v50 }
  0x88   :  { %v240_v51 = vpop.f32.mrf.mxu0  ;;  %v276_v52 = vpop.f32.mrf.mxu1 }
  0x89   :  { %434 = vst.msk [vmem:[#allocation2 + $0x1] sm:$0xff] %vm433_vm2, %v240_v51 }
  0x8a   :  { %446 = vst.msk [vmem:[#allocation2 + $0x91] sm:$0xff] %vm433_vm2, %v276_v52 }
  0x8f   :  { %v312_v53 = vpop.f32.mrf.mxu2  ;;  %v348_v54 = vpop.f32.mrf.mxu3 }
  0x90   :  { %458 = vst.msk [vmem:[#allocation2 + $0x121] sm:$0xff] %vm433_vm2, %v312_v53  ;;  %v243_v55 = vpop.f32.mrf.mxu0  ;;  %v279_v56 = vpop.f32.mrf.mxu1 }
  0x91   :  { %470 = vst.msk [vmem:[#allocation2 + $0x1b1] sm:$0xff] %vm433_vm2, %v348_v54 }
  0x92   :  { %435 = vst.msk [vmem:[#allocation2 + $0x9] sm:$0xff] %vm433_vm2, %v243_v55 }
  0x93   :  { %447 = vst.msk [vmem:[#allocation2 + $0x99] sm:$0xff] %vm433_vm2, %v279_v56 }
  0x97   :  { %v315_v57 = vpop.f32.mrf.mxu2  ;;  %v351_v58 = vpop.f32.mrf.mxu3 }
  0x98   :  { %459 = vst.msk [vmem:[#allocation2 + $0x129] sm:$0xff] %vm433_vm2, %v315_v57  ;;  %v246_v59 = vpop.f32.mrf.mxu0  ;;  %v282_v60 = vpop.f32.mrf.mxu1 }
  0x99   :  { %v482_v61 = vld [vmem:[#allocation2] ss:$2 sm:$0xff]  ;;  %v530_v62 = vld [vmem:[#allocation2 + $0x1] ss:$2 sm:$0xff]  ;;  %471 = vst.msk [vmem:[#allocation2 + $0x1b9] sm:$0xff] %vm433_vm2, %v351_v58 }
  0x9a   :  { %v577_v63 = vadd.f32 %v530_v62, %v482_v61  ;;  %v494_v0 = vld [vmem:[#allocation2 + $0x90] ss:$2 sm:$0xff]  ;;  %v542_v1 = vld [vmem:[#allocation2 + $0x91] ss:$2 sm:$0xff]  ;;  %436 = vst.msk [vmem:[#allocation2 + $0x19] sm:$0xff] %vm433_vm2, %v246_v59 }
  0x9b   :  { %v602_v2 = vld [vmem:[#allocation2 + $0x2] ss:$2 sm:$0xff]  ;;  %v583_v3 = vadd.f32 %v542_v1, %v494_v0  ;;  %v614_v5 = vld [vmem:[#allocation2 + $0x92] ss:$2 sm:$0xff]  ;;  %448 = vst.msk [vmem:[#allocation2 + $0xa9] sm:$0xff] %vm433_vm2, %v282_v60 }
  0x9c   :  { %v649_v4 = vadd.f32 %v602_v2, %v577_v63 }
  0x9d   :  { %v655_v6 = vadd.f32 %v614_v5, %v583_v3 }
  0x9e   :  { %v673_v7 = vmul.f32 0.11111111, %v649_v4 }
  0x9f   :  { %v679_v8 = vmul.f32 0.11111111, %v655_v6  ;;  %v506_v9 = vld [vmem:[#allocation2 + $0x120] ss:$2 sm:$0xff]  ;;  %v554_v10 = vld [vmem:[#allocation2 + $0x121] ss:$2 sm:$0xff]  ;;  %v318_v11 = vpop.f32.mrf.mxu2  ;;  %v354_v12 = vpop.f32.mrf.mxu3 }
  0xa0   :  { %697 = vst.msk [vmem:[#allocation6] sm:$0xff] %vm433_vm2, %v673_v7  ;;  %v589_v13 = vadd.f32 %v554_v10, %v506_v9  ;;  %v249_v14 = vpop.f32.mrf.mxu0  ;;  %v285_v15 = vpop.f32.mrf.mxu1  ;;  %v626_v16 = vld [vmem:[#allocation2 + $0x122] ss:$2 sm:$0xff]  ;;  %v566_v19 = vld [vmem:[#allocation2 + $0x1b1] ss:$2 sm:$0xff] }
  0xa1   :  { %703 = vst.msk [vmem:[#allocation6 + $0x30] sm:$0xff] %vm433_vm2, %v679_v8  ;;  %v518_v18 = vld [vmem:[#allocation2 + $0x1b0] ss:$2 sm:$0xff] }
  0xa2   :  { %v661_v17 = vadd.f32 %v626_v16, %v589_v13  ;;  %v595_v20 = vadd.f32 %v566_v19, %v518_v18  ;;  %460 = vst.msk [vmem:[#allocation2 + $0x139] sm:$0xff] %vm433_vm2, %v318_v11  ;;  %v638_v22 = vld [vmem:[#allocation2 + $0x1b2] ss:$2 sm:$0xff] }
  0xa3   :  { %472 = vst.msk [vmem:[#allocation2 + $0x1c9] sm:$0xff] %vm433_vm2, %v354_v12 }
  0xa4   :  { %v685_v21 = vmul.f32 0.11111111, %v661_v17  ;;  %v667_v23 = vadd.f32 %v638_v22, %v595_v20  ;;  %437 = vst.msk [vmem:[#allocation2 + $0x21] sm:$0xff] %vm433_vm2, %v249_v14 }
  0xa5   :  { %449 = vst.msk [vmem:[#allocation2 + $0xb1] sm:$0xff] %vm433_vm2, %v285_v15 }
  0xa6   :  { %709 = vst.msk [vmem:[#allocation6 + $0x60] sm:$0xff] %vm433_vm2, %v685_v21  ;;  %v691_v24 = vmul.f32 0.11111111, %v667_v23 }
  0xa7   :  { %v321_v25 = vpop.f32.mrf.mxu2  ;;  %v357_v26 = vpop.f32.mrf.mxu3 }
  0xa8   :  { %461 = vst.msk [vmem:[#allocation2 + $0x141] sm:$0xff] %vm433_vm2, %v321_v25  ;;  %v252_v27 = vpop.f32.mrf.mxu0  ;;  %v288_v28 = vpop.f32.mrf.mxu1 }
  0xa9   :  { %715 = vst.msk [vmem:[#allocation6 + $0x90] sm:$0xff] %vm433_vm2, %v691_v24 }
  0xaa   :  { %473 = vst.msk [vmem:[#allocation2 + $0x1d1] sm:$0xff] %vm433_vm2, %v357_v26 }
  0xab   :  { %438 = vst.msk [vmem:[#allocation2 + $0x31] sm:$0xff] %vm433_vm2, %v252_v27  ;;  %v484_v29 = vld [vmem:[#allocation2 + $0x18] ss:$2 sm:$0xff]  ;;  %v532_v30 = vld [vmem:[#allocation2 + $0x19] ss:$2 sm:$0xff] }
  0xac   :  { %v578_v31 = vadd.f32 %v532_v30, %v484_v29  ;;  %450 = vst.msk [vmem:[#allocation2 + $0xc1] sm:$0xff] %vm433_vm2, %v288_v28  ;;  %v604_v32 = vld [vmem:[#allocation2 + $0x1a] ss:$2 sm:$0xff]  ;;  %v544_v34 = vld [vmem:[#allocation2 + $0xa9] ss:$2 sm:$0xff] }
  0xad   :  { %v496_v33 = vld [vmem:[#allocation2 + $0xa8] ss:$2 sm:$0xff] }
  0xae   :  { %v650_v35 = vadd.f32 %v604_v32, %v578_v31  ;;  %v584_v36 = vadd.f32 %v544_v34, %v496_v33  ;;  %v616_v41 = vld [vmem:[#allocation2 + $0xaa] ss:$2 sm:$0xff] }
  0xaf   :  { %v508_v37 = vld [vmem:[#allocation2 + $0x138] ss:$2 sm:$0xff]  ;;  %v556_v38 = vld [vmem:[#allocation2 + $0x139] ss:$2 sm:$0xff]  ;;  %v324_v39 = vpop.f32.mrf.mxu2  ;;  %v360_v40 = vpop.f32.mrf.mxu3 }
  0xb0   :  { %v590_v42 = vadd.f32 %v556_v38, %v508_v37  ;;  %v628_v43 = vld [vmem:[#allocation2 + $0x13a] ss:$2 sm:$0xff]  ;;  %462 = vst.msk [vmem:[#allocation2 + $0x151] sm:$0xff] %vm433_vm2, %v324_v39  ;;  %v255_v44 = vpop.f32.mrf.mxu0  ;;  %v291_v45 = vpop.f32.mrf.mxu1  ;;  %v674_v46 = vmul.f32 0.11111111, %v650_v35  ;;  %v656_v47 = vadd.f32 %v616_v41, %v584_v36 }
  0xb1   :  { %v520_v48 = vld [vmem:[#allocation2 + $0x1c8] ss:$2 sm:$0xff]  ;;  %v568_v49 = vld [vmem:[#allocation2 + $0x1c9] ss:$2 sm:$0xff]  ;;  %474 = vst.msk [vmem:[#allocation2 + $0x1e1] sm:$0xff] %vm433_vm2, %v360_v40 }
  0xb2   :  { %v662_v50 = vadd.f32 %v628_v43, %v590_v42  ;;  %v596_v51 = vadd.f32 %v568_v49, %v520_v48  ;;  %698 = vst.msk [vmem:[#allocation6 + $0x8] sm:$0xff] %vm433_vm2, %v674_v46  ;;  %v680_v52 = vmul.f32 0.11111111, %v656_v47  ;;  %v640_v53 = vld [vmem:[#allocation2 + $0x1ca] ss:$2 sm:$0xff] }
  0xb3   :  { %439 = vst.msk [vmem:[#allocation2 + $0x39] sm:$0xff] %vm433_vm2, %v255_v44 }
  0xb4   :  { %v686_v54 = vmul.f32 0.11111111, %v662_v50  ;;  %v668_v55 = vadd.f32 %v640_v53, %v596_v51  ;;  %704 = vst.msk [vmem:[#allocation6 + $0x38] sm:$0xff] %vm433_vm2, %v680_v52 }
  0xb5   :  { %451 = vst.msk [vmem:[#allocation2 + $0xc9] sm:$0xff] %vm433_vm2, %v291_v45 }
  0xb6   :  { %710 = vst.msk [vmem:[#allocation6 + $0x68] sm:$0xff] %vm433_vm2, %v686_v54  ;;  %v692_v56 = vmul.f32 0.11111111, %v668_v55 }
  0xb7   :  { %v327_v57 = vpop.f32.mrf.mxu2  ;;  %v363_v58 = vpop.f32.mrf.mxu3 }
  0xb8   :  { %716 = vst.msk [vmem:[#allocation6 + $0x98] sm:$0xff] %vm433_vm2, %v692_v56  ;;  %v258_v59 = vpop.f32.mrf.mxu0  ;;  %v294_v60 = vpop.f32.mrf.mxu1 }
  0xb9   :  { %463 = vst.msk [vmem:[#allocation2 + $0x159] sm:$0xff] %vm433_vm2, %v327_v57 }
  0xba   :  { %475 = vst.msk [vmem:[#allocation2 + $0x1e9] sm:$0xff] %vm433_vm2, %v363_v58  ;;  %v486_v61 = vld [vmem:[#allocation2 + $0x30] ss:$2 sm:$0xff]  ;;  %v534_v62 = vld [vmem:[#allocation2 + $0x31] ss:$2 sm:$0xff] }
  0xbb   :  { %v579_v63 = vadd.f32 %v534_v62, %v486_v61  ;;  %440 = vst.msk [vmem:[#allocation2 + $0x49] sm:$0xff] %vm433_vm2, %v258_v59  ;;  %v606_v0 = vld [vmem:[#allocation2 + $0x32] ss:$2 sm:$0xff] }
  0xbc   :  { %452 = vst.msk [vmem:[#allocation2 + $0xd9] sm:$0xff] %vm433_vm2, %v294_v60  ;;  %v498_v2 = vld [vmem:[#allocation2 + $0xc0] ss:$2 sm:$0xff]  ;;  %v546_v3 = vld [vmem:[#allocation2 + $0xc1] ss:$2 sm:$0xff] }
  0xbd   :  { %v651_v1 = vadd.f32 %v606_v0, %v579_v63  ;;  %v585_v4 = vadd.f32 %v546_v3, %v498_v2  ;;  %v618_v5 = vld [vmem:[#allocation2 + $0xc2] ss:$2 sm:$0xff] }
  0xbf   :  { %v330_v6 = vpop.f32.mrf.mxu2  ;;  %v366_v7 = vpop.f32.mrf.mxu3  ;;  %v675_v8 = vmul.f32 0.11111111, %v651_v1  ;;  %v657_v13 = vadd.f32 %v618_v5, %v585_v4 }
  0xc0   :  { %v510_v9 = vld [vmem:[#allocation2 + $0x150] ss:$2 sm:$0xff]  ;;  %v558_v10 = vld [vmem:[#allocation2 + $0x151] ss:$2 sm:$0xff]  ;;  %v261_v11 = vpop.f32.mrf.mxu0  ;;  %v297_v12 = vpop.f32.mrf.mxu1  ;;  %464 = vst.msk [vmem:[#allocation2 + $0x169] sm:$0xff] %vm433_vm2, %v330_v6 }
  0xc1   :  { %v591_v14 = vadd.f32 %v558_v10, %v510_v9  ;;  %v522_v15 = vld [vmem:[#allocation2 + $0x1e0] ss:$2 sm:$0xff]  ;;  %v570_v16 = vld [vmem:[#allocation2 + $0x1e1] ss:$2 sm:$0xff]  ;;  %699 = vst.msk [vmem:[#allocation6 + $0x10] sm:$0xff] %vm433_vm2, %v675_v8 }
  0xc2   :  { %v630_v17 = vld [vmem:[#allocation2 + $0x152] ss:$2 sm:$0xff]  ;;  %v597_v18 = vadd.f32 %v570_v16, %v522_v15  ;;  %v681_v19 = vmul.f32 0.11111111, %v657_v13  ;;  %v642_v21 = vld [vmem:[#allocation2 + $0x1e2] ss:$2 sm:$0xff] }
  0xc3   :  { %v663_v20 = vadd.f32 %v630_v17, %v591_v14  ;;  %476 = vst.msk [vmem:[#allocation2 + $0x1f9] sm:$0xff] %vm433_vm2, %v366_v7 }
  0xc4   :  { %v669_v22 = vadd.f32 %v642_v21, %v597_v18  ;;  %705 = vst.msk [vmem:[#allocation6 + $0x40] sm:$0xff] %vm433_vm2, %v681_v19 }
  0xc5   :  { %v687_v23 = vmul.f32 0.11111111, %v663_v20  ;;  %441 = vst.msk [vmem:[#allocation2 + $0x51] sm:$0xff] %vm433_vm2, %v261_v11 }
  0xc6   :  { %v693_v24 = vmul.f32 0.11111111, %v669_v22  ;;  %453 = vst.msk [vmem:[#allocation2 + $0xe1] sm:$0xff] %vm433_vm2, %v297_v12 }
  0xc7   :  { %711 = vst.msk [vmem:[#allocation6 + $0x70] sm:$0xff] %vm433_vm2, %v687_v23  ;;  %v333_v25 = vpop.f32.mrf.mxu2  ;;  %v369_v26 = vpop.f32.mrf.mxu3 }
  0xc8   :  { %717 = vst.msk [vmem:[#allocation6 + $0xa0] sm:$0xff] %vm433_vm2, %v693_v24  ;;  %v264_v27 = vpop.f32.mrf.mxu0  ;;  %v300_v28 = vpop.f32.mrf.mxu1 }
  0xc9   :  { %465 = vst.msk [vmem:[#allocation2 + $0x171] sm:$0xff] %vm433_vm2, %v333_v25 }
  0xca   :  { %477 = vst.msk [vmem:[#allocation2 + $0x201] sm:$0xff] %vm433_vm2, %v369_v26 }
  0xcb   :  { %442 = vst.msk [vmem:[#allocation2 + $0x61] sm:$0xff] %vm433_vm2, %v264_v27 }
  0xcc   :  { %v488_v29 = vld [vmem:[#allocation2 + $0x48] ss:$2 sm:$0xff]  ;;  %v536_v30 = vld [vmem:[#allocation2 + $0x49] ss:$2 sm:$0xff]  ;;  %454 = vst.msk [vmem:[#allocation2 + $0xf1] sm:$0xff] %vm433_vm2, %v300_v28 }
  0xcd   :  { %v580_v31 = vadd.f32 %v536_v30, %v488_v29  ;;  %v608_v32 = vld [vmem:[#allocation2 + $0x4a] ss:$2 sm:$0xff]  ;;  %v548_v37 = vld [vmem:[#allocation2 + $0xd9] ss:$2 sm:$0xff]  ;;  %v620_v41 = vld [vmem:[#allocation2 + $0xda] ss:$2 sm:$0xff] }
  0xce   :  { %v500_v36 = vld [vmem:[#allocation2 + $0xd8] ss:$2 sm:$0xff] }
  0xcf   :  { %v336_v33 = vpop.f32.mrf.mxu2  ;;  %v372_v34 = vpop.f32.mrf.mxu3  ;;  %v652_v35 = vadd.f32 %v608_v32, %v580_v31  ;;  %v586_v40 = vadd.f32 %v548_v37, %v500_v36 }
  0xd0   :  { %v267_v38 = vpop.f32.mrf.mxu0  ;;  %v303_v39 = vpop.f32.mrf.mxu1  ;;  %v512_v42 = vld [vmem:[#allocation2 + $0x168] ss:$2 sm:$0xff]  ;;  %v560_v43 = vld [vmem:[#allocation2 + $0x169] ss:$2 sm:$0xff]  ;;  %466 = vst.msk [vmem:[#allocation2 + $0x181] sm:$0xff] %vm433_vm2, %v336_v33 }
  0xd1   :  { %v676_v44 = vmul.f32 0.11111111, %v652_v35  ;;  %v592_v45 = vadd.f32 %v560_v43, %v512_v42  ;;  %v524_v46 = vld [vmem:[#allocation2 + $0x1f8] ss:$2 sm:$0xff]  ;;  %v572_v47 = vld [vmem:[#allocation2 + $0x1f9] ss:$2 sm:$0xff]  ;;  %v658_v48 = vadd.f32 %v620_v41, %v586_v40 }
  0xd2   :  { %v632_v49 = vld [vmem:[#allocation2 + $0x16a] ss:$2 sm:$0xff]  ;;  %v598_v50 = vadd.f32 %v572_v47, %v524_v46  ;;  %v644_v52 = vld [vmem:[#allocation2 + $0x1fa] ss:$2 sm:$0xff]  ;;  %478 = vst.msk [vmem:[#allocation2 + $0x211] sm:$0xff] %vm433_vm2, %v372_v34 }
  0xd3   :  { %700 = vst.msk [vmem:[#allocation6 + $0x18] sm:$0xff] %vm433_vm2, %v676_v44  ;;  %v664_v51 = vadd.f32 %v632_v49, %v592_v45  ;;  %v682_v53 = vmul.f32 0.11111111, %v658_v48 }
  0xd4   :  { %v670_v54 = vadd.f32 %v644_v52, %v598_v50  ;;  %443 = vst.msk [vmem:[#allocation2 + $0x69] sm:$0xff] %vm433_vm2, %v267_v38 }
  0xd5   :  { %v688_v55 = vmul.f32 0.11111111, %v664_v51  ;;  %706 = vst.msk [vmem:[#allocation6 + $0x48] sm:$0xff] %vm433_vm2, %v682_v53 }
  0xd6   :  { %v694_v56 = vmul.f32 0.11111111, %v670_v54  ;;  %455 = vst.msk [vmem:[#allocation2 + $0xf9] sm:$0xff] %vm433_vm2, %v303_v39 }
  0xd7   :  { %v339_v57 = vpop.f32.mrf.mxu2  ;;  %v375_v58 = vpop.f32.mrf.mxu3  ;;  %712 = vst.msk [vmem:[#allocation6 + $0x78] sm:$0xff] %vm433_vm2, %v688_v55 }
  0xd8   :  { %718 = vst.msk [vmem:[#allocation6 + $0xa8] sm:$0xff] %vm433_vm2, %v694_v56  ;;  %v270_v59 = vpop.f32.mrf.mxu0  ;;  %v306_v60 = vpop.f32.mrf.mxu1 }
  0xd9   :  { %467 = vst.msk [vmem:[#allocation2 + $0x189] sm:$0xff] %vm433_vm2, %v339_v57 }
  0xda   :  { %479 = vst.msk [vmem:[#allocation2 + $0x219] sm:$0xff] %vm433_vm2, %v375_v58 }
  0xdb   :  { %v490_v61 = vld [vmem:[#allocation2 + $0x60] ss:$2 sm:$0xff]  ;;  %v538_v62 = vld [vmem:[#allocation2 + $0x61] ss:$2 sm:$0xff]  ;;  %444 = vst.msk [vmem:[#allocation2 + $0x79] sm:$0xff] %vm433_vm2, %v270_v59 }
  0xdc   :  { %v581_v63 = vadd.f32 %v538_v62, %v490_v61  ;;  %v610_v0 = vld [vmem:[#allocation2 + $0x62] ss:$2 sm:$0xff]  ;;  %456 = vst.msk [vmem:[#allocation2 + $0x109] sm:$0xff] %vm433_vm2, %v306_v60 }
  0xdd   :  { %v502_v4 = vld [vmem:[#allocation2 + $0xf0] ss:$2 sm:$0xff]  ;;  %v550_v5 = vld [vmem:[#allocation2 + $0xf1] ss:$2 sm:$0xff] }
  0xde   :  { %v653_v3 = vadd.f32 %v610_v0, %v581_v63  ;;  %v587_v7 = vadd.f32 %v550_v5, %v502_v4  ;;  %v622_v10 = vld [vmem:[#allocation2 + $0xf2] ss:$2 sm:$0xff] }
  0xdf   :  { %v342_v1 = vpop.f32.mrf.mxu2  ;;  %v378_v2 = vpop.f32.mrf.mxu3 }
  0xe0   :  { %468 = vst.msk [vmem:[#allocation2 + $0x199] sm:$0xff] %vm433_vm2, %v342_v1  ;;  %v677_v6 = vmul.f32 0.11111111, %v653_v3  ;;  %v514_v8 = vld [vmem:[#allocation2 + $0x180] ss:$2 sm:$0xff]  ;;  %v273_v14 = vpop.f32.mrf.mxu0  ;;  %v659_v15 = vadd.f32 %v622_v10, %v587_v7  ;;  %v309_v18 = vpop.f32.mrf.mxu1 }
  0xe1   :  { %v562_v9 = vld [vmem:[#allocation2 + $0x181] ss:$2 sm:$0xff]  ;;  %v526_v12 = vld [vmem:[#allocation2 + $0x210] ss:$2 sm:$0xff]  ;;  %v574_v13 = vld [vmem:[#allocation2 + $0x211] ss:$2 sm:$0xff] }
  0xe2   :  { %v593_v11 = vadd.f32 %v562_v9, %v514_v8  ;;  %701 = vst.msk [vmem:[#allocation6 + $0x20] sm:$0xff] %vm433_vm2, %v677_v6  ;;  %v634_v16 = vld [vmem:[#allocation2 + $0x182] ss:$2 sm:$0xff]  ;;  %v599_v17 = vadd.f32 %v574_v13, %v526_v12  ;;  %v646_v20 = vld [vmem:[#allocation2 + $0x212] ss:$2 sm:$0xff] }
  0xe3   :  { %480 = vst.msk [vmem:[#allocation2 + $0x229] sm:$0xff] %vm433_vm2, %v378_v2  ;;  %v683_v21 = vmul.f32 0.11111111, %v659_v15 }
  0xe4   :  { %v665_v19 = vadd.f32 %v634_v16, %v593_v11  ;;  %v671_v22 = vadd.f32 %v646_v20, %v599_v17  ;;  %445 = vst.msk [vmem:[#allocation2 + $0x81] sm:$0xff] %vm433_vm2, %v273_v14 }
  0xe5   :  { %457 = vst.msk [vmem:[#allocation2 + $0x111] sm:$0xff] %vm433_vm2, %v309_v18 }
  0xe6   :  { %v689_v23 = vmul.f32 0.11111111, %v665_v19  ;;  %707 = vst.msk [vmem:[#allocation6 + $0x50] sm:$0xff] %vm433_vm2, %v683_v21  ;;  %v695_v24 = vmul.f32 0.11111111, %v671_v22 }
  0xe7   :  { %v345_v25 = vpop.f32.mrf.mxu2  ;;  %v381_v26 = vpop.f32.mrf.mxu3 }
  0xe8   :  { %713 = vst.msk [vmem:[#allocation6 + $0x80] sm:$0xff] %vm433_vm2, %v689_v23 }
  0xe9   :  { %719 = vst.msk [vmem:[#allocation6 + $0xb0] sm:$0xff] %vm433_vm2, %v695_v24 }
  0xea   :  { %469 = vst.msk [vmem:[#allocation2 + $0x1a1] sm:$0xff] %vm433_vm2, %v345_v25 }
  0xeb   :  { %481 = vst.msk [vmem:[#allocation2 + $0x231] sm:$0xff] %vm433_vm2, %v381_v26  ;;  %v492_v27 = vld [vmem:[#allocation2 + $0x78] ss:$2 sm:$0xff]  ;;  %v540_v28 = vld [vmem:[#allocation2 + $0x79] ss:$2 sm:$0xff] }
  0xec   :  { %v582_v29 = vadd.f32 %v540_v28, %v492_v27  ;;  %v504_v30 = vld [vmem:[#allocation2 + $0x108] ss:$2 sm:$0xff]  ;;  %v552_v31 = vld [vmem:[#allocation2 + $0x109] ss:$2 sm:$0xff] }
  0xed   :  { %v612_v32 = vld [vmem:[#allocation2 + $0x7a] ss:$2 sm:$0xff]  ;;  %v588_v33 = vadd.f32 %v552_v31, %v504_v30  ;;  %v624_v35 = vld [vmem:[#allocation2 + $0x10a] ss:$2 sm:$0xff] }
  0xee   :  { %v654_v34 = vadd.f32 %v612_v32, %v582_v29 }
  0xef   :  { %v660_v36 = vadd.f32 %v624_v35, %v588_v33 }
  0xf0   :  { %v678_v37 = vmul.f32 0.11111111, %v654_v34 }
  0xf1   :  { %v516_v38 = vld [vmem:[#allocation2 + $0x198] ss:$2 sm:$0xff]  ;;  %v564_v39 = vld [vmem:[#allocation2 + $0x199] ss:$2 sm:$0xff]  ;;  %v684_v40 = vmul.f32 0.11111111, %v660_v36 }
  0xf2   :  { %v594_v41 = vadd.f32 %v564_v39, %v516_v38  ;;  %v528_v42 = vld [vmem:[#allocation2 + $0x228] ss:$2 sm:$0xff]  ;;  %702 = vst.msk [vmem:[#allocation6 + $0x28] sm:$0xff] %vm433_vm2, %v678_v37  ;;  %v576_v44 = vld [vmem:[#allocation2 + $0x229] ss:$2 sm:$0xff] }
  0xf3   :  { %v636_v43 = vld [vmem:[#allocation2 + $0x19a] ss:$2 sm:$0xff]  ;;  %708 = vst.msk [vmem:[#allocation6 + $0x58] sm:$0xff] %vm433_vm2, %v684_v40  ;;  %v600_v46 = vadd.f32 %v576_v44, %v528_v42  ;;  %v648_v47 = vld [vmem:[#allocation2 + $0x22a] ss:$2 sm:$0xff] }
  0xf4   :  { %v666_v45 = vadd.f32 %v636_v43, %v594_v41 }
  0xf5   :  { %v672_v49 = vadd.f32 %v648_v47, %v600_v46 }
  0xf6   :  { %v690_v48 = vmul.f32 0.11111111, %v666_v45 }
  0xf7   :  { %v696_v50 = vmul.f32 0.11111111, %v672_v49 }
  0xf8   :  { %714 = vst.msk [vmem:[#allocation6 + $0x88] sm:$0xff] %vm433_vm2, %v690_v48 }
  0xf9   :  { %720 = vst.msk [vmem:[#allocation6 + $0xb8] sm:$0xff] %vm433_vm2, %v696_v50 }
  0xfa   :  { %733 = dma.vmem_to_hbm [thread:$0]  %s726_s1, 3072, %s728_s22, [#allocation5], %s852_s14, %s852_s14, %s853_s15  }
  0xfb   :  { %849 = dma.done.wait [#allocation5], 3072  }
  0xfc   :  { %850 = vsyncadd [#allocation5], 4294964224 }
  0xfd   :  { %738 = vsyncpa [#allocation4], 1 }
  0xfe   :  { %739 = vsyncpa [#allocation5], 1 }

</bundles_post_ra>
